<compile_context>
chip_gen: v5e
topology: v5e:2x2
jax: 0.10.0
libtpu: 0.0.40
codegen_flags: <defaults>
</compile_context>

<pallas_src>
import math

import jax
import jax.numpy as jnp
from jax.experimental import pallas as pl
from jax.experimental.pallas import tpu as pltpu

_LANES = 128          # lane-dense last dim -> unmasked vector stores
_TR_TARGET = 1024     # rows per block: 3 * 1024 * 128 * 4 B = 1.5 MiB / block

_EPS = 2.220446049250313e-16  # torch.finfo(torch.float64).eps (matches kornia)
_INV_12_92 = 1.0 / 12.92
_INV_1_055 = 1.0 / 1.055

# D65 reference white, Observer 2
_XW, _YW, _ZW = 0.95047, 1.0, 1.08883
_DW = _XW + 15.0 * _YW + 3.0 * _ZW
_U_W = 4.0 * _XW / _DW
_V_W = 9.0 * _YW / _DW


def _rgb_to_luv_kernel(img_ref, out_ref):
    # Block shape: (1, 3, TR, 128).  Compute in f32 regardless of I/O dtype
    # (v5e has no bf16 VPU/EUP; the casts ride free in spare VALU slots).
    r = img_ref[0, 0, :, :].astype(jnp.float32)
    g = img_ref[0, 1, :, :].astype(jnp.float32)
    b = img_ref[0, 2, :, :].astype(jnp.float32)

    # sRGB -> linear RGB (gamma expansion); constant divides -> multiplies.
    rs = jnp.where(r > 0.04045, jnp.power((r + 0.055) * _INV_1_055, 2.4), r * _INV_12_92)
    gs = jnp.where(g > 0.04045, jnp.power((g + 0.055) * _INV_1_055, 2.4), g * _INV_12_92)
    bs = jnp.where(b > 0.04045, jnp.power((b + 0.055) * _INV_1_055, 2.4), b * _INV_12_92)

    # linear RGB -> XYZ.  Kept as 9 VPU FMAs on purpose (a K=3 MXU contraction
    # would waste >97% of the systolic array and add a result-FIFO drain).
    x = 0.412453 * rs + 0.357580 * gs + 0.180423 * bs
    y = 0.212671 * rs + 0.715160 * gs + 0.072169 * bs
    z = 0.019334 * rs + 0.119193 * gs + 0.950227 * bs

    # XYZ -> Luv.
    L = jnp.where(y > 0.008856,
                  116.0 * jnp.power(y, 1.0 / 3.0) - 16.0,
                  903.3 * y)

    # One reciprocal of the shared denominator instead of two divides.
    # approx=False keeps u/v inside the 1e-4 rel tolerance vs. exact division.
    inv_denom = pl.reciprocal(x + 15.0 * y + 3.0 * z + _EPS, approx=False)
    u_p = 4.0 * x * inv_denom
    v_p = 9.0 * y * inv_denom

    thirteen_L = 13.0 * L
    u = thirteen_L * (u_p - _U_W)
    v = thirteen_L * (v_p - _V_W)

    out_ref[0, 0, :, :] = L.astype(out_ref.dtype)
    out_ref[0, 1, :, :] = u.astype(out_ref.dtype)
    out_ref[0, 2, :, :] = v.astype(out_ref.dtype)


def rgb_to_luv(image: jax.Array) -> jax.Array:
    """RGB (*, 3, H, W) in [0, 1] -> Luv (*, 3, H, W). I/O dtype preserved."""
    if image.ndim < 3 or image.shape[-3] != 3:
        raise ValueError(
            f"Input size must have a shape of (*, 3, H, W). Got {image.shape}")

    orig_shape = image.shape
    H, W = image.shape[-2], image.shape[-1]
    lead = image.shape[:-3]
    B = math.prod(lead) if lead else 1
    N = H * W

    # Lane-dense, sublane-dense layout: (B, 3, rows_padded, 128).
    rows = (N + _LANES - 1) // _LANES
    rows8 = ((rows + 7) // 8) * 8
    tr = min(_TR_TARGET, rows8)                      # multiple of 8
    rows_padded = ((rows + tr - 1) // tr) * tr       # multiple of tr
    n_pad = rows_padded * _LANES

    x = image.reshape(B, 3, N)
    if n_pad != N:
        # Padded pixels are zeros; they produce finite Luv and are sliced off.
        x = jnp.pad(x, ((0, 0), (0, 0), (0, n_pad - N)))
    x = x.reshape(B, 3, rows_padded, _LANES)

    out = pl.pallas_call(
        _rgb_to_luv_kernel,
        out_shape=jax.ShapeDtypeStruct((B, 3, rows_padded, _LANES), image.dtype),
        grid_spec=pltpu.PrefetchScalarGridSpec(
            num_scalar_prefetch=0,
            grid=(B, rows_padded // tr),
            in_specs=[pl.BlockSpec((1, 3, tr, _LANES), lambda b, r: (b, 0, r, 0))],
            out_specs=pl.BlockSpec((1, 3, tr, _LANES), lambda b, r: (b, 0, r, 0)),
        ),
        compiler_params=pltpu.CompilerParams(
            dimension_semantics=("parallel", "parallel")),
    )(x)

    out = out.reshape(B, 3, n_pad)[:, :, :N]
    return out.reshape(orig_shape)


def _rgb_to_luv_ref(image: jax.Array) -> jax.Array:
    # Pure-JAX reference (mirrors the kornia formula) for correctness checking.
    r, g, b = image[..., 0, :, :], image[..., 1, :, :], image[..., 2, :, :]
    rs = jnp.where(r > 0.04045, ((r + 0.055) / 1.055) ** 2.4, r / 12.92)
    gs = jnp.where(g > 0.04045, ((g + 0.055) / 1.055) ** 2.4, g / 12.92)
    bs = jnp.where(b > 0.04045, ((b + 0.055) / 1.055) ** 2.4, b / 12.92)
    x = 0.412453 * rs + 0.357580 * gs + 0.180423 * bs
    y = 0.212671 * rs + 0.715160 * gs + 0.072169 * bs
    z = 0.019334 * rs + 0.119193 * gs + 0.950227 * bs
    L = jnp.where(y > 0.008856, 116.0 * y ** (1.0 / 3.0) - 16.0, 903.3 * y)
    d = x + 15.0 * y + 3.0 * z + _EPS
    u = 13.0 * L * (4.0 * x / d - _U_W)
    v = 13.0 * L * (9.0 * y / d - _V_W)
    return jnp.stack((L, u, v), axis=-3)


if __name__ == "__main__":
    key = jax.random.PRNGKey(0)
    x = jax.random.uniform(key, (2, 3, 16, 16), dtype=jnp.float32)  # RGB in [0, 1]
    out = rgb_to_luv(x)
    jax.block_until_ready(out)
    ref = _rgb_to_luv_ref(x)
    assert out.shape == (2, 3, 16, 16)
    assert out.dtype == x.dtype
    assert jnp.allclose(out, ref, atol=1e-4, rtol=1e-4)
    print("KERNEL_OK")
</pallas_src>

<mosaic_0001>
module attributes {stable_mosaic.version = 11 : i64} {
  func.func @_rgb_to_luv_kernel(%arg0: i32, %arg1: i32, %arg2: memref<1x3x8x128xf32, #tpu.memory_space<vmem>>, %arg3: memref<1x3x8x128xf32, #tpu.memory_space<vmem>>) attributes {dimension_semantics = [#tpu.dimension_semantics<parallel>, #tpu.dimension_semantics<parallel>], iteration_bounds = array<i64: 2, 1>, scalar_prefetch = 0 : i64, scratch_operands = 0 : i64, tpu.core_type = #tpu.core_type<tc>, window_params = [{transform_indices = @transform_0, window_bounds = array<i64: 1, 3, 8, 128>}, {transform_indices = @transform_1, window_bounds = array<i64: 1, 3, 8, 128>}]} {
    %c0 = arith.constant 0 : index
    %c0_0 = arith.constant 0 : index
    %c0_1 = arith.constant 0 : index
    %c0_2 = arith.constant 0 : index
    %0 = vector.load %arg2[%c0, %c0_0, %c0_1, %c0_2] : memref<1x3x8x128xf32, #tpu.memory_space<vmem>>, vector<1x1x8x128xf32>
    %1 = vector.shape_cast %0 : vector<1x1x8x128xf32> to vector<8x128xf32>
    %c0_3 = arith.constant 0 : index
    %c1 = arith.constant 1 : index
    %c0_4 = arith.constant 0 : index
    %c0_5 = arith.constant 0 : index
    %2 = vector.load %arg2[%c0_3, %c1, %c0_4, %c0_5] : memref<1x3x8x128xf32, #tpu.memory_space<vmem>>, vector<1x1x8x128xf32>
    %3 = vector.shape_cast %2 : vector<1x1x8x128xf32> to vector<8x128xf32>
    %c0_6 = arith.constant 0 : index
    %c2 = arith.constant 2 : index
    %c0_7 = arith.constant 0 : index
    %c0_8 = arith.constant 0 : index
    %4 = vector.load %arg2[%c0_6, %c2, %c0_7, %c0_8] : memref<1x3x8x128xf32, #tpu.memory_space<vmem>>, vector<1x1x8x128xf32>
    %5 = vector.shape_cast %4 : vector<1x1x8x128xf32> to vector<8x128xf32>
    %cst = arith.constant 4.045000e-02 : f32
    %6 = vector.broadcast %cst : f32 to vector<8x128xf32>
    %7 = arith.cmpf ogt, %1, %6 : vector<8x128xf32>
    %cst_9 = arith.constant 5.500000e-02 : f32
    %8 = vector.broadcast %cst_9 : f32 to vector<8x128xf32>
    %9 = arith.addf %1, %8 : vector<8x128xf32>
    %cst_10 = arith.constant 0.947867274 : f32
    %10 = vector.broadcast %cst_10 : f32 to vector<8x128xf32>
    %11 = arith.mulf %9, %10 : vector<8x128xf32>
    %cst_11 = arith.constant 2.400000e+00 : f32
    %12 = vector.broadcast %cst_11 : f32 to vector<8x128xf32>
    %13 = math.powf %11, %12 : vector<8x128xf32>
    %cst_12 = arith.constant 0.0773993805 : f32
    %14 = vector.broadcast %cst_12 : f32 to vector<8x128xf32>
    %15 = arith.mulf %1, %14 : vector<8x128xf32>
    %16 = arith.select %7, %13, %15 : vector<8x128xi1>, vector<8x128xf32>
    %cst_13 = arith.constant 4.045000e-02 : f32
    %17 = vector.broadcast %cst_13 : f32 to vector<8x128xf32>
    %18 = arith.cmpf ogt, %3, %17 : vector<8x128xf32>
    %cst_14 = arith.constant 5.500000e-02 : f32
    %19 = vector.broadcast %cst_14 : f32 to vector<8x128xf32>
    %20 = arith.addf %3, %19 : vector<8x128xf32>
    %cst_15 = arith.constant 0.947867274 : f32
    %21 = vector.broadcast %cst_15 : f32 to vector<8x128xf32>
    %22 = arith.mulf %20, %21 : vector<8x128xf32>
    %cst_16 = arith.constant 2.400000e+00 : f32
    %23 = vector.broadcast %cst_16 : f32 to vector<8x128xf32>
    %24 = math.powf %22, %23 : vector<8x128xf32>
    %cst_17 = arith.constant 0.0773993805 : f32
    %25 = vector.broadcast %cst_17 : f32 to vector<8x128xf32>
    %26 = arith.mulf %3, %25 : vector<8x128xf32>
    %27 = arith.select %18, %24, %26 : vector<8x128xi1>, vector<8x128xf32>
    %cst_18 = arith.constant 4.045000e-02 : f32
    %28 = vector.broadcast %cst_18 : f32 to vector<8x128xf32>
    %29 = arith.cmpf ogt, %5, %28 : vector<8x128xf32>
    %cst_19 = arith.constant 5.500000e-02 : f32
    %30 = vector.broadcast %cst_19 : f32 to vector<8x128xf32>
    %31 = arith.addf %5, %30 : vector<8x128xf32>
    %cst_20 = arith.constant 0.947867274 : f32
    %32 = vector.broadcast %cst_20 : f32 to vector<8x128xf32>
    %33 = arith.mulf %31, %32 : vector<8x128xf32>
    %cst_21 = arith.constant 2.400000e+00 : f32
    %34 = vector.broadcast %cst_21 : f32 to vector<8x128xf32>
    %35 = math.powf %33, %34 : vector<8x128xf32>
    %cst_22 = arith.constant 0.0773993805 : f32
    %36 = vector.broadcast %cst_22 : f32 to vector<8x128xf32>
    %37 = arith.mulf %5, %36 : vector<8x128xf32>
    %38 = arith.select %29, %35, %37 : vector<8x128xi1>, vector<8x128xf32>
    %cst_23 = arith.constant 4.124530e-01 : f32
    %39 = vector.broadcast %cst_23 : f32 to vector<8x128xf32>
    %40 = arith.mulf %39, %16 : vector<8x128xf32>
    %cst_24 = arith.constant 3.575800e-01 : f32
    %41 = vector.broadcast %cst_24 : f32 to vector<8x128xf32>
    %42 = arith.mulf %41, %27 : vector<8x128xf32>
    %43 = arith.addf %40, %42 : vector<8x128xf32>
    %cst_25 = arith.constant 1.804230e-01 : f32
    %44 = vector.broadcast %cst_25 : f32 to vector<8x128xf32>
    %45 = arith.mulf %44, %38 : vector<8x128xf32>
    %46 = arith.addf %43, %45 : vector<8x128xf32>
    %cst_26 = arith.constant 2.126710e-01 : f32
    %47 = vector.broadcast %cst_26 : f32 to vector<8x128xf32>
    %48 = arith.mulf %47, %16 : vector<8x128xf32>
    %cst_27 = arith.constant 7.151600e-01 : f32
    %49 = vector.broadcast %cst_27 : f32 to vector<8x128xf32>
    %50 = arith.mulf %49, %27 : vector<8x128xf32>
    %51 = arith.addf %48, %50 : vector<8x128xf32>
    %cst_28 = arith.constant 7.216900e-02 : f32
    %52 = vector.broadcast %cst_28 : f32 to vector<8x128xf32>
    %53 = arith.mulf %52, %38 : vector<8x128xf32>
    %54 = arith.addf %51, %53 : vector<8x128xf32>
    %cst_29 = arith.constant 1.933400e-02 : f32
    %55 = vector.broadcast %cst_29 : f32 to vector<8x128xf32>
    %56 = arith.mulf %55, %16 : vector<8x128xf32>
    %cst_30 = arith.constant 1.191930e-01 : f32
    %57 = vector.broadcast %cst_30 : f32 to vector<8x128xf32>
    %58 = arith.mulf %57, %27 : vector<8x128xf32>
    %59 = arith.addf %56, %58 : vector<8x128xf32>
    %cst_31 = arith.constant 9.502270e-01 : f32
    %60 = vector.broadcast %cst_31 : f32 to vector<8x128xf32>
    %61 = arith.mulf %60, %38 : vector<8x128xf32>
    %62 = arith.addf %59, %61 : vector<8x128xf32>
    %cst_32 = arith.constant 8.856000e-03 : f32
    %63 = vector.broadcast %cst_32 : f32 to vector<8x128xf32>
    %64 = arith.cmpf ogt, %54, %63 : vector<8x128xf32>
    %cst_33 = arith.constant 0.333333343 : f32
    %65 = vector.broadcast %cst_33 : f32 to vector<8x128xf32>
    %66 = math.powf %54, %65 : vector<8x128xf32>
    %cst_34 = arith.constant 1.160000e+02 : f32
    %67 = vector.broadcast %cst_34 : f32 to vector<8x128xf32>
    %68 = arith.mulf %67, %66 : vector<8x128xf32>
    %cst_35 = arith.constant 1.600000e+01 : f32
    %69 = vector.broadcast %cst_35 : f32 to vector<8x128xf32>
    %70 = arith.subf %68, %69 : vector<8x128xf32>
    %cst_36 = arith.constant 903.299987 : f32
    %71 = vector.broadcast %cst_36 : f32 to vector<8x128xf32>
    %72 = arith.mulf %71, %54 : vector<8x128xf32>
    %73 = arith.select %64, %70, %72 : vector<8x128xi1>, vector<8x128xf32>
    %cst_37 = arith.constant 1.500000e+01 : f32
    %74 = vector.broadcast %cst_37 : f32 to vector<8x128xf32>
    %75 = arith.mulf %74, %54 : vector<8x128xf32>
    %76 = arith.addf %46, %75 : vector<8x128xf32>
    %cst_38 = arith.constant 3.000000e+00 : f32
    %77 = vector.broadcast %cst_38 : f32 to vector<8x128xf32>
    %78 = arith.mulf %77, %62 : vector<8x128xf32>
    %79 = arith.addf %76, %78 : vector<8x128xf32>
    %cst_39 = arith.constant 2.22044605E-16 : f32
    %80 = vector.broadcast %cst_39 : f32 to vector<8x128xf32>
    %81 = arith.addf %79, %80 : vector<8x128xf32>
    %82 = tpu.reciprocal %81 : vector<8x128xf32> -> vector<8x128xf32>
    %cst_40 = arith.constant 4.000000e+00 : f32
    %83 = vector.broadcast %cst_40 : f32 to vector<8x128xf32>
    %84 = arith.mulf %83, %46 : vector<8x128xf32>
    %85 = arith.mulf %84, %82 : vector<8x128xf32>
    %cst_41 = arith.constant 9.000000e+00 : f32
    %86 = vector.broadcast %cst_41 : f32 to vector<8x128xf32>
    %87 = arith.mulf %86, %54 : vector<8x128xf32>
    %88 = arith.mulf %87, %82 : vector<8x128xf32>
    %cst_42 = arith.constant 1.300000e+01 : f32
    %89 = vector.broadcast %cst_42 : f32 to vector<8x128xf32>
    %90 = arith.mulf %89, %73 : vector<8x128xf32>
    %cst_43 = arith.constant 0.197839826 : f32
    %91 = vector.broadcast %cst_43 : f32 to vector<8x128xf32>
    %92 = arith.subf %85, %91 : vector<8x128xf32>
    %93 = arith.mulf %90, %92 : vector<8x128xf32>
    %cst_44 = arith.constant 0.468336314 : f32
    %94 = vector.broadcast %cst_44 : f32 to vector<8x128xf32>
    %95 = arith.subf %88, %94 : vector<8x128xf32>
    %96 = arith.mulf %90, %95 : vector<8x128xf32>
    %c0_45 = arith.constant 0 : index
    %c0_46 = arith.constant 0 : index
    %c0_47 = arith.constant 0 : index
    %c0_48 = arith.constant 0 : index
    %97 = vector.load %arg3[%c0_45, %c0_46, %c0_47, %c0_48] : memref<1x3x8x128xf32, #tpu.memory_space<vmem>>, vector<1x1x8x128xf32>
    %98 = vector.shape_cast %97 : vector<1x1x8x128xf32> to vector<8x128xf32>
    %99 = vector.shape_cast %73 : vector<8x128xf32> to vector<1x1x8x128xf32>
    tpu.vector_store %arg3[%c0_45, %c0_46, %c0_47, %c0_48], %99 {strides = array<i32>} : memref<1x3x8x128xf32, #tpu.memory_space<vmem>>, vector<1x1x8x128xf32>,
    %c0_49 = arith.constant 0 : index
    %c1_50 = arith.constant 1 : index
    %c0_51 = arith.constant 0 : index
    %c0_52 = arith.constant 0 : index
    %100 = vector.load %arg3[%c0_49, %c1_50, %c0_51, %c0_52] : memref<1x3x8x128xf32, #tpu.memory_space<vmem>>, vector<1x1x8x128xf32>
    %101 = vector.shape_cast %100 : vector<1x1x8x128xf32> to vector<8x128xf32>
    %102 = vector.shape_cast %93 : vector<8x128xf32> to vector<1x1x8x128xf32>
    tpu.vector_store %arg3[%c0_49, %c1_50, %c0_51, %c0_52], %102 {strides = array<i32>} : memref<1x3x8x128xf32, #tpu.memory_space<vmem>>, vector<1x1x8x128xf32>,
    %c0_53 = arith.constant 0 : index
    %c2_54 = arith.constant 2 : index
    %c0_55 = arith.constant 0 : index
    %c0_56 = arith.constant 0 : index
    %103 = vector.load %arg3[%c0_53, %c2_54, %c0_55, %c0_56] : memref<1x3x8x128xf32, #tpu.memory_space<vmem>>, vector<1x1x8x128xf32>
    %104 = vector.shape_cast %103 : vector<1x1x8x128xf32> to vector<8x128xf32>
    %105 = vector.shape_cast %96 : vector<8x128xf32> to vector<1x1x8x128xf32>
    tpu.vector_store %arg3[%c0_53, %c2_54, %c0_55, %c0_56], %105 {strides = array<i32>} : memref<1x3x8x128xf32, #tpu.memory_space<vmem>>, vector<1x1x8x128xf32>,
    return
  }
  func.func @transform_0(%arg0: i32, %arg1: i32) -> (i32, i32, i32, i32) {
    %c0_i32 = arith.constant 0 : i32
    %c0_i32_0 = arith.constant 0 : i32
    %c0_i32_1 = arith.constant 0 : i32
    return %arg0, %c0_i32, %arg1, %c0_i32_0 : i32, i32, i32, i32
  }
  func.func @transform_1(%arg0: i32, %arg1: i32) -> (i32, i32, i32, i32) {
    %c0_i32 = arith.constant 0 : i32
    %c0_i32_0 = arith.constant 0 : i32
    %c0_i32_1 = arith.constant 0 : i32
    return %arg0, %c0_i32, %arg1, %c0_i32_0 : i32, i32, i32, i32
  }
}

</mosaic_0001>

<bundles_post_ra>
// kernel: tpu_custom_call.1
= control target key start
LH: loop header
LB: loop body
LE: loop exit
PB: predicated region body
PF: predicated region fallthrough
CT: control target
= control target key end

     0   :  { %6 = vsyncpa [#allocation3], 0  ;;  %s1058_s0 = inlined_call_operand.hbm [shape: f32[2,3,8,128], index: 0, kind: input, shape index: {}]   ;;  %s1059_s1 = inlined_call_operand.hbm [shape: f32[2,3,8,128], index: 1, kind: output, shape index: {}]  }
   0x1   :  { %8 = vsyncpa [#allocation3 + $0x1], 0 }
   0x2   :  { %9 = vsyncpa [#allocation4], 0 }
   0x3   :  { %11 = vsyncpa [#allocation4 + $0x1], 0  ;;  %s796_s6 = smov 0   ;;  %s798_s7 = smov 0  }
   0x4   :  { %s800_s8 = smov 0   ;;  %s802_s9 = smov 0  }
   0x5   :  { %s804_s10 = smov 0   ;;  %s806_s11 = smov 0  }
   0x6 LB: > { %s333_s12 = sadd.s32 4294967295, %s780_s11   ;;  %s334_s13 = sadd.s32 4294967294, %s780_s11   ;;  %s780_s11 = sphi %s806_s11, %s17_s11   ;;  %s776_s10 = sphi %s804_s10, %s1070_s10   ;;  %s772_s9 = sphi %s802_s9, %s1069_s9   ;;  %s768_s8 = sphi %s800_s8, %s1068_s8   ;;  %s764_s7 = sphi %s798_s7, %s1067_s7   ;;  %s760_s6 = sphi %s796_s6, %s1066_s6  }
   0x7   : > { %s29_s14 = sadd.s32 1, %s776_s10  ;;  %s38_s15 = sadd.s32 1, %s768_s8 }
   0x8   : > { %p31_p0 = scmp.ge.s32.totalorder %s29_s14, 2  ;;  %p45_p1 = scmp.ne.s32.totalorder %s768_s8, %s764_s7 }
   0x9   : > { %p46_p2 = scmp.eq.s32.totalorder %s780_s11, 0  ;;  %p51_p3 = scmp.ne.s32.totalorder %s764_s7, %s760_s6 }
   0xa   : > { %s1072_s14 = smov (%p31_p0, %s29_s14), 0  ;;  %p52_p5 = scmp.eq.s32.totalorder %s333_s12, 0 }
   0xb   : > { %p837_p4 = por %p46_p2, %p45_p1  ;;  %s33_s17 = ssub.s32 %s776_s10, %s1072_s14 }
   0xc   : > { %p77_p6 = scmp.eq.s32.totalorder %s333_s12, 1  ;;  %p36_p7 = scmp.eq.s32.totalorder %s33_s17, 0 }
   0xd   : > { %p843_p8 = por %p52_p5, %p51_p3  ;;  %p83_p10 = scmp.eq.s32.totalorder %s334_s13, 1 }
   0xe   : > { %p847_p9 = por %p77_p6, %p45_p1  ;;  %p336_p12 = scmp.ge.s32.totalorder %s780_s11, 2 }
   0xf   : > { %s852_s20 = scalar_select %p36_p7, %s768_s8, %s38_s15  }
  0x10   : > { %p854_p11 = por %p83_p10, %p51_p3  ;;  %p602_p13 = scmp.lt.s32.totalorder %s780_s11, 2 }
  0x11   : > { %s103_s22 = sand.u32 1, %s768_s8   ;;  %s350_s24 = smul.u32 24, %s776_s10 }
  0x12   : > { %s349_s23 = smul.u32 24, %s103_s22  ;;  %p595_p0 = pnand %p602_p13, %p837_p4 }
  0x13   : > { %s113_s27 = scalar_lea.hbm %s1058_s0, %s350_s24  ;;  %p338_p1 = scmp.ge.s32.totalorder %s780_s11, 1 }
  0x14   : > { %s107_s28 = scalar_lea.vmem [#allocation2], %s349_s23  ;;  %s114_s30 = sshll.u32 %s113_s27, 4  ;;  %s115_s30 = int_to_ptr.hbm [resolvable:$true] %s114_s30 }
  0x15   : > { %s116_s29 = sshll.u32 %s107_s28, 4  ;;  %s104_s2 = scalar_lea.sflag [#allocation3], %s103_s22  ;;  %s117_s29 = int_to_ptr.vmem [resolvable:$true] %s116_s29 }
  0x16   : > { %s782_s3 = smov 128   ;;  %s783_s4 = smov 8  }
  0x17   : > { %597 = dma.hbm_to_vmem [thread:$0]  (!%p595_p0), %s115_s30, 384, %s117_s29, %s104_s2, %s782_s3, %s782_s3, %s783_s4  }
  0x18   : > { %p124_p2 = scmp.lt.s32.totalorder %s780_s11, 3 }
  0x1a   : > { %p125_p3 = pnand %p338_p1, %p124_p2 }
  0x1b   : > { %s870_s5 = sand.u32 (!%p125_p3), 1, %s764_s7  }
  0x1c   : > { %128 = sbr.rel (%p125_p3) target bundleno = 160 (0xa0), region = 24  ;;  %s131_s13 = scalar_lea.sflag (!%p125_p3), [#allocation3], %s870_s5 }
  0x1d   : > { %s351_s12 = smul.u32 (!%p125_p3), 24, %s870_s5 }
  0x1f   : > { %s134_s15 = scalar_lea.vmem (!%p125_p3), [#allocation2], %s351_s12 }
  0x21   : > { %751 = dma.done.wait (%p843_p8), %s131_s13, 384  }
  0x22   : > { %753 = vsyncadd (%p843_p8), %s131_s13, 4294966912  ;;  %v880_v0 = vld [vmem:[%s134_s15] sm:$0xff]  ;;  %v882_v1 = vld [vmem:[%s134_s15 + $0x8] sm:$0xff]  ;;  %s589_s16 = smul.u32 24, %s772_s9  ;;  %s153_s23 = scalar_lea.vmem [#allocation5], %s351_s12 }
  0x23   : > { %v884_v2 = vld [vmem:[%s134_s15 + $0x10] sm:$0xff]  ;;  %v160_v3 = vadd.f32 0.055, %v880_v0  ;;  %v166_v4 = vadd.f32 0.055, %v882_v1  ;;  %s245_s24 = sshll.u32 %s153_s23, 4  ;;  %s246_s24 = int_to_ptr.vmem [resolvable:$true] %s245_s24 }
  0x24   : > { %v172_v5 = vadd.f32 0.055, %v884_v2  ;;  %s244_s22 = scalar_lea.hbm %s1059_s1, %s589_s16  ;;  %s232_s25 = scalar_lea.sflag [#allocation4], %s870_s5 }
  0x25   : > { %v889_v6 = vmul.f32 0.9478673, %v160_v3  ;;  %v891_v7 = vmul.f32 0.9478673, %v166_v4  ;;  %s247_s9 = sshll.u32 %s244_s22, 4  ;;  %s718_s30 = scalar_lea.hbm %s1059_s1, 48  ;;  %s248_s9 = int_to_ptr.hbm [resolvable:$true] %s247_s9 }
  0x26   : > { %v893_v8 = vmul.f32 0.9478673, %v172_v5  ;;  %s712_s26 = sshra.s32 %s248_s9, 4  ;;  %s713_s26 = int_to_ptr.hbm [resolvable:$true] %s712_s26 }
  0x27   : > { %v896_v9 = vand.u32 2147483647, %v889_v6  ;;  %v899_v10 = vand.u32 2147483647, %v891_v7  ;;  %vm403_vm15 = vcmp.lt.f32.partialorder %v889_v6, 0  ;;  %s714_s27 = scalar_lea.hbm %s713_s26, 24  ;;  %p719_p7 = scmp.lt.s32.totalorder %s713_s26, %s1059_s1 }
  0x28   : > { %v902_v11 = vand.u32 2147483647, %v893_v8  ;;  %p715_p4 = scmp.ne.s32.totalorder %s713_s26, %s714_s27  ;;  %p720_p8 = scmp.lt.s32.totalorder %s718_s30, %s714_s27 }
  0x29   : > { %v362_v12 = vand.u32 8388607, %v896_v9  ;;  %v433_v13 = vand.u32 8388607, %v899_v10  ;;  %v358_v28 = vand.u32 2139095040, %v896_v9  ;;  %v429_v30 = vand.u32 2139095040, %v899_v10 }
  0x2a   : > { %v504_v14 = vand.u32 8388607, %v902_v11  ;;  %v500_v51 = vand.u32 2139095040, %v902_v11  ;;  %vm394_vm3 = vcmp.eq.f32.partialorder %v896_v9, 0.0  ;;  %vm396_vm4 = vweird.f32 %v896_v9  ;;  %p716_p5 = pnand %p715_p4, %p847_p9  ;;  %p721_p10 = por %p720_p8, %p719_p7 }
  0x2b   : > { %v363_v15 = vor.u32 8388608, %v362_v12  ;;  %v434_v16 = vor.u32 8388608, %v433_v13  ;;  %v359_v36 = vshrl.u32 %v358_v28, 23  ;;  %v430_v40 = vshrl.u32 %v429_v30, 23 }
  0x2c   : > { %v505_v19 = vor.u32 8388608, %v504_v14  ;;  %v501_v63 = vshrl.u32 %v500_v51, 23  ;;  %vm395_vm5 = vcmp.lt.f32.partialorder %v896_v9, 0.0  ;;  %vm467_vm6 = vweird.f32 %v899_v10  ;;  %p717_p6 = pneg %p716_p5 }
  0x2d   : > { %v365_v17 = vand.u32 8388607, %v363_v15  ;;  %v436_v18 = vand.u32 8388607, %v434_v16  ;;  %v421_v48 = vadd.s32 4294967169, %v359_v36  ;;  %v492_v52 = vadd.s32 4294967169, %v430_v40 }
  0x2e   : > { %v507_v22 = vand.u32 8388607, %v505_v19  ;;  %vm466_vm7 = vcmp.lt.f32.partialorder %v899_v10, 0.0  ;;  %vm393_vm8 = vcmp.eq.f32.partialorder %v896_v9, 1.0  ;;  %vm465_vm9 = vcmp.eq.f32.partialorder %v899_v10, 0.0  ;;  %p722_p13 = pnand %p721_p10, %p717_p6 }
  0x2f   : > { %v907_v20 = vor.u32 1065353216, %v365_v17  ;;  %v909_v21 = vor.u32 1065353216, %v436_v18  ;;  %v370_v60 = vadd.s32 1, %v421_v48  ;;  %v441_v3 = vadd.s32 1, %v492_v52 }
  0x30   : > { %v915_v25 = vor.u32 1065353216, %v507_v22  ;;  %vm464_vm10 = vcmp.eq.f32.partialorder %v899_v10, 1.0  ;;  %vm538_vm11 = vweird.f32 %v902_v11  ;;  %vm537_vm12 = vcmp.lt.f32.partialorder %v902_v11, 0.0 }
  0x31   : > { %vm367_vm0 = vcmp.ge.f32.partialorder %v907_v20, 1.4142135  ;;  %v368_v23 = vmul.f32 0.5, %v907_v20  ;;  %vm438_vm1 = vcmp.ge.f32.partialorder %v909_v21, 1.4142135  ;;  %v439_v24 = vmul.f32 0.5, %v909_v21 }
  0x32   : > { %vm509_vm2 = vcmp.ge.f32.partialorder %v915_v25, 1.4142135  ;;  %v510_v32 = vmul.f32 0.5, %v915_v25  ;;  %vm536_vm13 = vcmp.eq.f32.partialorder %v902_v11, 0.0  ;;  %vm535_vm14 = vcmp.eq.f32.partialorder %v902_v11, 1.0 }
  0x33   : > { %v369_v26 = vsel %vm367_vm0, %v368_v23, %v907_v20  ;;  %v440_v27 = vsel %vm438_vm1, %v439_v24, %v909_v21  ;;  %v563_v23 = vadd.s32 4294967169, %v501_v63 }
  0x34   : > { %v924_v29 = vadd.f32 -1.0, %v369_v26  ;;  %v927_v31 = vadd.f32 -1.0, %v440_v27  ;;  %v511_v35 = vsel %vm509_vm2, %v510_v32, %v915_v25  ;;  %v371_v26 = vsel %vm367_vm0, %v370_v60, %v421_v48 }
  0x35   : > { %v938_v39 = vadd.f32 -1.0, %v511_v35  ;;  %v442_v35 = vsel %vm438_vm1, %v441_v3, %v492_v52  ;;  %vm159_vm0 = vcmp.gt.f32.partialorder %v880_v0, 0.04045  ;;  %vm404_vm1 = vcmp.eq.f32.partialorder %v889_v6, 0 }
  0x36   : > { %v373_v33 = vmul.f32 %v924_v29, %v924_v29  ;;  %v444_v34 = vmul.f32 %v927_v31, %v927_v31 }
  0x37   : > { %v515_v45 = vmul.f32 %v938_v39, %v938_v39 }
  0x38   : > { %v374_v37 = vmul.f32 0.12621109, %v373_v33  ;;  %v376_v38 = vmul.f32 -0.20706727, %v373_v33  ;;  %v445_v41 = vmul.f32 0.12621109, %v444_v34 }
  0x39   : > { %v447_v42 = vmul.f32 -0.20706727, %v444_v34  ;;  %v516_v55 = vmul.f32 0.12621109, %v515_v45  ;;  %v518_v15 = vmul.f32 -0.20706727, %v515_v45 }
  0x3a   : > { %v375_v43 = vadd.f32 0.21545328, %v374_v37  ;;  %v377_v44 = vadd.f32 -0.23896284, %v376_v38  ;;  %v446_v46 = vadd.f32 0.21545328, %v445_v41 }
  0x3b   : > { %v448_v47 = vadd.f32 -0.23896284, %v447_v42  ;;  %v517_v12 = vadd.f32 0.21545328, %v516_v55  ;;  %v519_v24 = vadd.f32 -0.23896284, %v518_v15 }
  0x3c   : > { %v378_v49 = vmul.f32 %v375_v43, %v373_v33  ;;  %v380_v50 = vmul.f32 %v377_v44, %v373_v33  ;;  %v449_v53 = vmul.f32 %v446_v46, %v444_v34  ;;  %v462_v43 = vcvt.s32.f32 %v442_v35 }
  0x3d   : > { %v451_v54 = vmul.f32 %v448_v47, %v444_v34  ;;  %v520_v18 = vmul.f32 %v517_v12, %v515_v45  ;;  %v522_v36 = vmul.f32 %v519_v24, %v515_v45  ;;  %v512_v44 = vadd.s32 1, %v563_v23 }
  0x3e   : > { %v379_v56 = vadd.f32 0.28795174, %v378_v49  ;;  %v381_v57 = vadd.f32 -0.3607037, %v380_v50  ;;  %v450_v58 = vadd.f32 0.28795174, %v449_v53 }
  0x3f   : > { %v452_v59 = vadd.f32 -0.3607037, %v451_v54  ;;  %v521_v30 = vadd.f32 0.28795174, %v520_v18  ;;  %v523_v41 = vadd.f32 -0.3607037, %v522_v36 }
  0x40   : > { %v382_v61 = vmul.f32 %v379_v56, %v373_v33  ;;  %v384_v62 = vmul.f32 %v381_v57, %v373_v33  ;;  %v453_v4 = vmul.f32 %v450_v58, %v444_v34 }
  0x41   : > { %v455_v5 = vmul.f32 %v452_v59, %v444_v34  ;;  %v524_v38 = vmul.f32 %v521_v30, %v515_v45 }
  0x42   : > { %v383_v13 = vadd.f32 0.48090908, %v382_v61  ;;  %v385_v14 = vadd.f32 -0.72134733, %v384_v62  ;;  %v454_v16 = vadd.f32 0.48090908, %v453_v4 }
  0x43   : > { %v456_v17 = vadd.f32 -0.72134733, %v455_v5  ;;  %v525_v46 = vadd.f32 0.48090908, %v524_v38 }
  0x44   : > { %v386_v19 = vmul.f32 %v383_v13, %v373_v33  ;;  %v388_v22 = vmul.f32 %v924_v29, %v385_v14  ;;  %v457_v27 = vmul.f32 %v454_v16, %v444_v34  ;;  %v391_v33 = vcvt.s32.f32 %v371_v26 }
  0x45   : > { %v459_v28 = vmul.f32 %v927_v31, %v456_v17  ;;  %v526_v34 = vmul.f32 %v523_v41, %v515_v45  ;;  %v528_v47 = vmul.f32 %v525_v46, %v515_v45  ;;  %v163_v16 = vmul.f32 0.07739938, %v880_v0 }
  0x46   : > { %v387_v32 = vadd.f32 1.442695, %v386_v19  ;;  %v458_v37 = vadd.f32 1.442695, %v457_v27 }
  0x47   : > { %v527_v49 = vadd.f32 -0.72134733, %v526_v34  ;;  %v529_v51 = vadd.f32 1.442695, %v528_v47 }
  0x48   : > { %v389_v40 = vadd.f32 %v388_v22, %v387_v32  ;;  %v460_v42 = vadd.f32 %v459_v28, %v458_v37  ;;  %v169_v22 = vmul.f32 0.07739938, %v882_v1  ;;  %v175_v32 = vmul.f32 0.07739938, %v884_v2 }
  0x4a   : > { %v390_v20 = vmul.f32 %v924_v29, %v389_v40  ;;  %v461_v21 = vmul.f32 %v927_v31, %v460_v42  ;;  %v513_v29 = vsel %vm509_vm2, %v512_v44, %v563_v23  ;;  %v530_v31 = vmul.f32 %v938_v39, %v527_v49 }
  0x4b   : > { %v533_v56 = vcvt.s32.f32 %v513_v29  ;;  %vm474_vm2 = vcmp.lt.f32.partialorder %v891_v7, 0 }
  0x4c   : > { %v392_v48 = vadd.f32 %v391_v33, %v390_v20  ;;  %v463_v50 = vadd.f32 %v462_v43, %v461_v21  ;;  %v531_v25 = vadd.f32 %v530_v31, %v529_v51 }
  0x4e   : > { %v397_v52 = vsel %vm396_vm4, %v896_v9, %v392_v48  ;;  %v468_v53 = vsel %vm467_vm6, %v899_v10, %v463_v50  ;;  %v532_v61 = vmul.f32 %v938_v39, %v531_v25  ;;  %vm408_vm4 = vcmp.eq.f32.partialorder %v896_v9, 2139095040 }
  0x4f   : > { %v398_v45 = vsel %vm395_vm5, nan, %v397_v52  ;;  %v469_v55 = vsel %vm466_vm7, nan, %v468_v53  ;;  %vm475_vm5 = vcmp.eq.f32.partialorder %v891_v7, 0  ;;  %vm416_vm6 = vcmp.ne.f32.partialorder %v889_v6, %v889_v6 }
  0x50   : > { %v399_v54 = vsel %vm394_vm3, -inf, %v398_v45  ;;  %v470_v58 = vsel %vm465_vm9, -inf, %v469_v55  ;;  %v534_v63 = vadd.f32 %v533_v56, %v532_v61  ;;  %vm405_vm3 = vcmp.eq.f32.partialorder %v889_v6, 1065353216 }
  0x51   : > { %v400_v57 = vsel %vm393_vm8, 0.0, %v399_v54  ;;  %v471_v60 = vsel %vm464_vm10, 0.0, %v470_v58  ;;  %vm479_vm7 = vcmp.eq.f32.partialorder %v899_v10, 2139095040  ;;  %vm487_vm8 = vcmp.ne.f32.partialorder %v891_v7, %v891_v7 }
  0x52   : > { %v401_v59 = vmul.f32 2.4, %v400_v57  ;;  %v472_v62 = vmul.f32 2.4, %v471_v60  ;;  %v539_v3 = vsel %vm538_vm11, %v902_v11, %v534_v63  ;;  %vm476_vm9 = vcmp.eq.f32.partialorder %v891_v7, 1065353216 }
  0x53   : > { %v540_v4 = vsel %vm537_vm12, nan, %v539_v3  ;;  %vm165_vm10 = vcmp.gt.f32.partialorder %v882_v1, 0.04045  ;;  %vm545_vm11 = vcmp.lt.f32.partialorder %v893_v8, 0  ;;  %vm546_vm12 = vcmp.eq.f32.partialorder %v893_v8, 0 }
  0x54   : > { %656 = vpow2.f32 %v401_v59  ;;  %v541_v5 = vsel %vm536_vm13, -inf, %v540_v4  ;;  %vm550_vm13 = vcmp.eq.f32.partialorder %v902_v11, 2139095040 }
  0x55   : > { %658 = vpow2.f32 %v472_v62  ;;  %v542_v39 = vsel %vm535_vm14, 0.0, %v541_v5  ;;  %vm558_vm14 = vcmp.ne.f32.partialorder %v893_v8, %v893_v8 }
  0x56   : > { %v543_v13 = vmul.f32 2.4, %v542_v39 }
  0x58   : > { %660 = vpow2.f32 %v543_v13 }
  0x5a   : > { %v657_v12 = vpop.eup %656 }
  0x5b   : > { %v659_v14 = vpop.eup %658  ;;  %v409_v15 = vsel %vm403_vm15, 2143289344, %v657_v12  ;;  %vm547_vm15 = vcmp.eq.f32.partialorder %v893_v8, 1065353216 }
  0x5c   : > { %v410_v17 = vsel %vm404_vm1, 0, %v409_v15  ;;  %v480_v18 = vsel %vm474_vm2, 2143289344, %v659_v14 }
  0x5d   : > { %v415_v19 = vsel %vm408_vm4, 2139095040, %v410_v17  ;;  %v481_v9 = vsel %vm475_vm5, 0, %v480_v18 }
  0x5e   : > { %v419_v23 = vsel %vm416_vm6, 2143289344, %v415_v19  ;;  %v486_v24 = vsel %vm479_vm7, 2139095040, %v481_v9  ;;  %v661_v7 = vpop.eup %660 }
  0x5f   : > { %v420_v26 = vsel %vm405_vm3, 1065353216, %v419_v23  ;;  %v490_v10 = vsel %vm487_vm8, 2143289344, %v486_v24  ;;  %v551_v36 = vsel %vm545_vm11, 2143289344, %v661_v7 }
  0x60   : > { %v164_v27 = vsel %vm159_vm0, %v420_v26, %v163_v16  ;;  %v491_v28 = vsel %vm476_vm9, 1065353216, %v490_v10  ;;  %v552_v37 = vsel %vm546_vm12, 0, %v551_v36  ;;  %vm171_vm0 = vcmp.gt.f32.partialorder %v884_v2, 0.04045 }
  0x61   : > { %v170_v30 = vsel %vm165_vm10, %v491_v28, %v169_v22  ;;  %v182_v1 = vmul.f32 0.212671, %v164_v27  ;;  %v187_v35 = vmul.f32 0.019334, %v164_v27  ;;  %v177_v38 = vmul.f32 0.412453, %v164_v27 }
  0x62   : > { %v183_v6 = vmul.f32 0.71516, %v170_v30  ;;  %v188_v0 = vmul.f32 0.119193, %v170_v30  ;;  %v178_v40 = vmul.f32 0.35758, %v170_v30 }
  0x63   : > { %v557_v33 = vsel %vm550_vm13, 2139095040, %v552_v37 }
  0x64   : > { %v561_v11 = vsel %vm558_vm14, 2143289344, %v557_v33  ;;  %v184_v42 = vadd.f32 %v183_v6, %v182_v1  ;;  %v189_v43 = vadd.f32 %v188_v0, %v187_v35  ;;  %v179_v46 = vadd.f32 %v178_v40, %v177_v38 }
  0x65   : > { %v562_v41 = vsel %vm547_vm15, 1065353216, %v561_v11 }
  0x66   : > { %v176_v44 = vsel %vm171_vm0, %v562_v41, %v175_v32 }
  0x67   : > { %v185_v20 = vmul.f32 0.072169, %v176_v44  ;;  %v180_v34 = vmul.f32 0.180423, %v176_v44  ;;  %v190_v21 = vmul.f32 0.950227, %v176_v44 }
  0x69   : > { %v1000_v47 = vadd.f32 %v185_v20, %v184_v42  ;;  %v191_v48 = vadd.f32 %v190_v21, %v189_v43  ;;  %v181_v49 = vadd.f32 %v180_v34, %v179_v46 }
  0x6b   : > { %v567_v8 = vand.u32 2147483647, %v1000_v47  ;;  %v198_v50 = vmul.f32 15.0, %v1000_v47  ;;  %v200_v29 = vmul.f32 3.0, %v191_v48  ;;  %v584_v12 = vand.u32 2147483648, %v1000_v47 }
  0x6c   : > { %vm566_vm7 = vcmp.lt.f32.partialorder %v1000_v47, 0.0  ;;  %vm565_vm8 = vcmp.eq.f32.partialorder %v1000_v47, 0.0  ;;  %v217_v17 = vmul.f32 4.0, %v181_v49  ;;  %v219_v18 = vmul.f32 9.0, %v1000_v47 }
  0x6d   : > { %662 = vlog2.f32 %v567_v8  ;;  %v199_v2 = vadd.f32 %v198_v50, %v181_v49  ;;  %vm581_vm4 = vweird.f32 %v567_v8  ;;  %vm583_vm5 = vcmp.eq.f32.partialorder %v567_v8, 0.0 }
  0x6e   : > { %vm568_vm9 = vcmp.eq.f32.partialorder %v567_v8, inf  ;;  %v196_v28 = vmul.f32 903.3, %v1000_v47  ;;  %vm192_vm10 = vcmp.gt.f32.partialorder %v1000_v47, 0.008856 }
  0x6f   : > { %v201_v51 = vadd.f32 %v200_v29, %v199_v2 }
  0x71   : > { %v202_v52 = vadd.f32 2.220446e-16, %v201_v51 }
  0x73   : > { %v663_v31 = vpop.eup %662  ;;  %664 = vrcp.f32 %v202_v52  ;;  %vm208_vm1 = vweird.f32 %v202_v52  ;;  %v214_v62 = vand.u32 2147483648, %v202_v52  ;;  %v212_v4 = vand.u32 2147483647, %v202_v52 }
  0x74   : > { %v571_v45 = vmul.f32 -0.33333334, %v663_v31 }
  0x75   : > { %v215_v13 = vor.u32 1.1754944e-38, %v214_v62  ;;  %vm213_vm6 = vcmp.eq.f32.partialorder %v212_v4, 8.507059e+37 }
  0x76   : > { %666 = vpow2.f32 %v571_v45 }
  0x79   : > { %v665_v53 = vpop.eup %664 }
  0x7a   : > { %v204_v54 = vmul.f32 %v665_v53, %v202_v52  ;;  %vm209_vm2 = vweird.f32 %v665_v53 }
  0x7b   : > { %vm1004_vm3 = vmor %vm208_vm1, %vm209_vm2 }
  0x7c   : > { %v667_v55 = vpop.eup %666  ;;  %v205_v57 = vsub.f32 1.0, %v204_v54 }
  0x7d   : > { %v573_v25 = vmul.f32 %v667_v55, %v667_v55 }
  0x7e   : > { %v206_v60 = vmul.f32 %v665_v53, %v205_v57 }
  0x7f   : > { %v574_v56 = vmul.f32 %v573_v25, %v567_v8 }
  0x80   : > { %v207_v3 = vadd.f32 %v665_v53, %v206_v60 }
  0x81   : > { %v575_v58 = vmul.f32 %v574_v56, %v573_v25 }
  0x82   : > { %v211_v15 = vsel %vm1004_vm3, %v665_v53, %v207_v3 }
  0x83   : > { %v576_v59 = vsub.f32 %v575_v58, %v667_v55  ;;  %v216_v9 = vsel %vm213_vm6, %v215_v13, %v211_v15 }
  0x84   : > { %v218_v26 = vmul.f32 %v217_v17, %v216_v9  ;;  %v220_v10 = vmul.f32 %v219_v18, %v216_v9 }
  0x85   : > { %v577_v61 = vmul.f32 -0.33333334, %v576_v59 }
  0x86   : > { %v342_v7 = vadd.f32 -0.19783983, %v218_v26  ;;  %v343_v32 = vadd.f32 -0.4683363, %v220_v10 }
  0x87   : > { %v578_v63 = vadd.f32 %v667_v55, %v577_v61 }
  0x89   : > { %v579_v39 = vmul.f32 %v578_v63, %v1000_v47 }
  0x8b   : > { %v580_v14 = vmul.f32 %v579_v39, %v578_v63 }
  0x8d   : > { %v582_v16 = vsel %vm581_vm4, %v1000_v47, %v580_v14 }
  0x8e   : > { %v585_v19 = vsel %vm583_vm5, %v584_v12, %v582_v16 }
  0x8f   : > { %v586_v22 = vsel %vm566_vm7, nan, %v585_v19 }
  0x90   : > { %v587_v23 = vsel %vm565_vm8, 0.0, %v586_v22 }
  0x91   : > { %v588_v24 = vsel %vm568_vm9, inf, %v587_v23 }
  0x92   : > { %v194_v27 = vmul.f32 116.0, %v588_v24 }
  0x94   : > { %v341_v30 = vadd.f32 -16.0, %v194_v27 }
  0x96   : > { %v197_v1 = vsel %vm192_vm10, %v341_v30, %v196_v28 }
  0x97   : > { %v221_v35 = vmul.f32 13.0, %v197_v1  ;;  %226 = vst [vmem:[%s153_s23] sm:$0xff] %v197_v1 }
  0x99   : > { %v223_v36 = vmul.f32 %v342_v7, %v221_v35  ;;  %v225_v6 = vmul.f32 %v343_v32, %v221_v35 }
  0x9b   : > { %344 = vst [vmem:[%s153_s23 + $0x8] sm:$0xff] %v223_v36 }
  0x9c   : > { %345 = vst [vmem:[%s153_s23 + $0x10] sm:$0xff] %v225_v6 }
  0x9d   : > { %725 = shalt.err (!%p722_p13)
}
  0x9e   : > { %s784_s4 = smov 128   ;;  %s785_s5 = smov 8  }
  0x9f   : > { %592 = dma.vmem_to_hbm [thread:$0]  (%p847_p9), %s246_s24, 384, %s248_s9, %s232_s25, %s784_s4, %s784_s4, %s785_s5  }
  0xa0 PF: > { %s262_s12 = sand.u32 1, %s760_s6   ;;  %p599_p0 = pnand %p336_p12, %p854_p11 }
  0xa1   : > { %s263_s13 = scalar_lea.sflag [#allocation4], %s262_s12 }
  0xa2   : > { %p600_p1 = pneg %p599_p0 }
  0xa4   : > { %755 = dma.done.wait (%p600_p1), %s263_s13, 384  }
  0xa5   : > { %757 = vsyncadd (%p600_p1), %s263_s13, 4294966912  ;;  %s17_s11 = sadd.s32 1, %s780_s11   ;;  %s1066_s6 = smov %s764_s7 }
  0xa6   : > { %p14_p2 = scmp.ge.s32.totalorder %s17_s11, 4   ;;  %s1067_s7 = smov %s768_s8 }
  0xa7   : > { %s1068_s8 = smov %s852_s20  ;;  %s1069_s9 = smov %s776_s10 }
  0xa8   : > { %s1070_s10 = smov %s1072_s14  ;;  %16 = sbr.rel (!%p14_p2) target bundleno = 6 (0x6), region = 73 }
  0xad   :  { %269 = vsyncpa [#allocation3], 1 }
  0xae   :  { %271 = vsyncpa [#allocation3 + $0x1], 1 }
  0xaf   :  { %272 = vsyncpa [#allocation4], 1 }
  0xb0   :  { %274 = vsyncpa [#allocation4 + $0x1], 1 }

</bundles_post_ra>
